<compile_context>
chip_gen: v6e
topology: v6e:2x2x1
jax: 0.10.0
libtpu: 0.0.40
codegen_flags: <defaults>
</compile_context>

<pallas_src>
import functools

import jax
import jax.numpy as jnp
from jax import lax
from jax.experimental import pallas as pl
from jax.experimental.pallas import tpu as pltpu

EPSILON = 1e-8


def _round_up(x, m):
    return (x + m - 1) // m * m


def _nce_tail_kernel(g_ref, q_ref, z_ref, o_ref, *, k1_actual, b_actual,
                     noise_ratio):
    """grid = (Bp // tile_b,), every block independent ("parallel").

    g_ref: (K1p, tile_b) gathered scores s[b, idx[b, k]]   (native dtype)
    q_ref: (K1p, tile_b) gathered noise probs Q[idx[b, k]] (f32)
    z_ref: (1, 1)        learned normalizer Z              (SMEM)
    o_ref: (1, tile_b)   per-row NCE loss (0 on padded batch lanes)
    """
    i = pl.program_id(0)
    k1p, tile_b = g_ref.shape

    z = z_ref[0, 0]
    s_shift = g_ref[...].astype(jnp.float32) - z            # log P = s - Z
    kq = jnp.float32(noise_ratio) * q_ref[...]               # K * Q[idx]
    # NOTE: if Q can contain exact zeros this diverges from the reference's
    # safe_log(x + EPSILON); demo Q is strictly positive.
    lkq = jnp.log(kq)                                        # log(K * Q[idx])

    # logaddexp(lkq, s_shift) == log(kQ + P); overflow-safe for large scores.
    mx = jnp.maximum(lkq, s_shift)
    mn = jnp.minimum(lkq, s_shift)
    log_denom = mx + jnp.log(1.0 + jnp.exp(mn - mx))

    # Sublane row 0 is the target column, rows 1..K the noise columns.
    row_k = lax.broadcasted_iota(jnp.int32, (k1p, tile_b), 0)
    log_num = jnp.where(row_k == 0, s_shift, lkq)
    logs = jnp.where(row_k < k1_actual, log_num - log_denom, 0.0)

    per_row = -jnp.sum(logs, axis=0, keepdims=True)          # (1, tile_b)

    # Zero out batch-padding lanes so the wrapper's sum/B is exact.
    lane = i * tile_b + lax.broadcasted_iota(jnp.int32, (1, tile_b), 1)
    o_ref[...] = jnp.where(lane < b_actual, per_row, 0.0)


def nce_loss_pallas(scores, target, noise_idx, Q, Z, K, *, tile_b=2048):
    """scores: (B, N) float, target: (B,) int, noise_idx: (B, K) int,
    Q: (N,) noise distribution, Z: learned normalizer (scalar), K: noise ratio."""
    B, N = scores.shape
    K1 = K + 1

    idx = jnp.concatenate(
        [target.reshape(B, 1).astype(jnp.int32), noise_idx.astype(jnp.int32)],
        axis=1)                                               # (B, K+1)

    # XLA-native gathers: only B*(K+1) score values ever leave HBM (vs B*N
    # for the old streaming kernel).  Scores stay in their native dtype; the
    # tiny gathered tile is upcast inside the kernel.
    g = jnp.take_along_axis(scores, idx, axis=1)              # (B, K+1)
    qg = Q.astype(jnp.float32)[idx]                           # (B, K+1)

    # Lane-dense layout: batch on lanes, K+1 on sublanes.
    g_t = g.T                                                 # (K+1, B)
    qg_t = qg.T

    K1p = _round_up(K1, 8)                                    # sublane multiple
    tile_b = max(128, min(_round_up(tile_b, 128), _round_up(B, 128)))
    Bp = _round_up(B, tile_b)

    # Only the tiny (K+1, B) arrays are padded; pad values are chosen finite
    # (scores 0, Q 1) so no inf/NaN exists anywhere, and padded rows/lanes are
    # masked inside the kernel (row_k < K+1, lane < B).
    g_p = jnp.pad(g_t, ((0, K1p - K1), (0, Bp - B)))
    qg_p = jnp.pad(qg_t, ((0, K1p - K1), (0, Bp - B)), constant_values=1.0)
    z = jnp.full((1, 1), Z, dtype=jnp.float32)

    grid = (Bp // tile_b,)

    out = pl.pallas_call(
        functools.partial(_nce_tail_kernel, k1_actual=K1, b_actual=B,
                          noise_ratio=K),
        out_shape=jax.ShapeDtypeStruct((1, Bp), jnp.float32),
        grid_spec=pltpu.PrefetchScalarGridSpec(
            num_scalar_prefetch=0,
            grid=grid,
            in_specs=[
                pl.BlockSpec((K1p, tile_b), lambda i: (0, i)),         # scores[idx]
                pl.BlockSpec((K1p, tile_b), lambda i: (0, i)),         # Q[idx]
                pl.BlockSpec(memory_space=pltpu.MemorySpace.SMEM),     # Z (1,1)
            ],
            out_specs=pl.BlockSpec((1, tile_b), lambda i: (0, i)),
        ),
        compiler_params=pltpu.CompilerParams(
            dimension_semantics=("parallel",)),
    )(g_p, qg_p, z)

    return jnp.sum(out) / jnp.float32(B)


def nce_loss_ref(scores, target, noise_idx, Q, Z, K):
    """Plain-JAX reference mirroring the PyTorch forward exactly."""
    idx = jnp.concatenate([target.reshape(-1, 1), noise_idx], axis=1)
    gathered = jnp.take_along_axis(scores, idx, axis=1)
    P = jnp.exp(gathered - Z)
    Qg = Q[idx]
    kQ = K * Qg
    model_loss = jnp.log(P[:, 0] / (kQ[:, 0] + P[:, 0]) + EPSILON)
    noise_loss = jnp.sum(jnp.log(kQ[:, 1:] / (kQ[:, 1:] + P[:, 1:]) + EPSILON),
                         axis=-1)
    return jnp.mean(-(model_loss + noise_loss))


if __name__ == "__main__":
    key = jax.random.PRNGKey(0)
    k_q, k_s, k_t, k_n = jax.random.split(key, 4)

    B, N, K = 16, 256, 15   # batch, vocab size, noise_ratio

    # Module buffers/parameters: noise distribution Q over N classes, Z=1.0.
    Q = jax.random.uniform(k_q, (N,), minval=0.1, maxval=1.0, dtype=jnp.float32)
    Q = Q / jnp.sum(Q)
    Z = 1.0

    # Forward inputs: model scores (B, N) and target class ids (B,).
    scores = jax.random.normal(k_s, (B, N), dtype=jnp.float32)
    target = jax.random.randint(k_t, (B,), 0, N, dtype=jnp.int32)

    # TODO(synk): torch.randint noise sampling (get_noise) has no in-kernel
    # equivalent here; noise indices are drawn in glue with a fixed PRNGKey.
    noise_idx = jax.random.randint(k_n, (B, K), 0, N, dtype=jnp.int32)

    loss = nce_loss_pallas(scores, target, noise_idx, Q, Z, K)
    loss = jax.block_until_ready(loss)

    ref = nce_loss_ref(scores, target, noise_idx, Q, Z, K)
    # Log-domain rewrite drops the +EPSILON inside safe_log, so the match is
    # to tolerance rather than bitwise.
    assert jnp.allclose(loss, ref, rtol=2e-5, atol=2e-4), (loss, ref)

    print("KERNEL_OK")
</pallas_src>

<mosaic_0001>
module attributes {stable_mosaic.version = 11 : i64} {
  func.func @_nce_tail_kernel(%arg0: i32, %arg1: memref<16x128xf32, #tpu.memory_space<vmem>>, %arg2: memref<16x128xf32, #tpu.memory_space<vmem>>, %arg3: memref<1x1xf32, #tpu.memory_space<smem>>, %arg4: memref<1x128xf32, #tpu.memory_space<vmem>>) attributes {dimension_semantics = [#tpu.dimension_semantics<parallel>], iteration_bounds = array<i64: 1>, scalar_prefetch = 0 : i64, scratch_operands = 0 : i64, tpu.core_type = #tpu.core_type<tc>, window_params = [{transform_indices = @transform_0, window_bounds = array<i64: 16, 128>}, {transform_indices = @transform_1, window_bounds = array<i64: 16, 128>}, {transform_indices = @transform_2, window_bounds = array<i64: 1, 1>}, {transform_indices = @transform_3, window_bounds = array<i64: 1, 128>}]} {
    %c0 = arith.constant 0 : index
    %c0_0 = arith.constant 0 : index
    %0 = memref.load %arg3[%c0, %c0_0] : memref<1x1xf32, #tpu.memory_space<smem>>
    %c0_1 = arith.constant 0 : index
    %c0_2 = arith.constant 0 : index
    %1 = vector.load %arg1[%c0_1, %c0_2] : memref<16x128xf32, #tpu.memory_space<vmem>>, vector<16x128xf32>
    %2 = vector.broadcast %0 : f32 to vector<16x128xf32>
    %3 = arith.subf %1, %2 : vector<16x128xf32>
    %c0_3 = arith.constant 0 : index
    %c0_4 = arith.constant 0 : index
    %4 = vector.load %arg2[%c0_3, %c0_4] : memref<16x128xf32, #tpu.memory_space<vmem>>, vector<16x128xf32>
    %cst = arith.constant 1.500000e+01 : f32
    %5 = vector.broadcast %cst : f32 to vector<16x128xf32>
    %6 = arith.mulf %5, %4 : vector<16x128xf32>
    %7 = math.log %6 : vector<16x128xf32>
    %8 = arith.maximumf %7, %3 : vector<16x128xf32>
    %9 = arith.minimumf %7, %3 : vector<16x128xf32>
    %10 = arith.subf %9, %8 : vector<16x128xf32>
    %11 = math.exp %10 : vector<16x128xf32>
    %cst_5 = arith.constant 1.000000e+00 : f32
    %12 = vector.broadcast %cst_5 : f32 to vector<16x128xf32>
    %13 = arith.addf %12, %11 : vector<16x128xf32>
    %14 = math.log %13 : vector<16x128xf32>
    %15 = arith.addf %8, %14 : vector<16x128xf32>
    %16 = tpu.iota {dimensions = array<i32: 0>} : vector<16x128xi32>
    %c0_i32 = arith.constant 0 : i32
    %17 = vector.broadcast %c0_i32 : i32 to vector<16x128xi32>
    %18 = arith.cmpi eq, %16, %17 : vector<16x128xi32>
    %19 = arith.select %18, %3, %7 : vector<16x128xi1>, vector<16x128xf32>
    %c16_i32 = arith.constant 16 : i32
    %20 = vector.broadcast %c16_i32 : i32 to vector<16x128xi32>
    %21 = arith.cmpi slt, %16, %20 : vector<16x128xi32>
    %22 = arith.subf %19, %15 : vector<16x128xf32>
    %cst_6 = arith.constant 0.000000e+00 : f32
    %23 = vector.broadcast %cst_6 : f32 to vector<16x128xf32>
    %24 = arith.select %21, %22, %23 : vector<16x128xi1>, vector<16x128xf32>
    %cst_7 = arith.constant dense<0.000000e+00> : vector<128xf32>
    %25 = vector.multi_reduction <add>, %24, %cst_7 [0] : vector<16x128xf32> to vector<128xf32>
    %26 = vector.shape_cast %25 : vector<128xf32> to vector<1x128xf32>
    %cst_8 = arith.constant 0.000000e+00 : f32
    %27 = vector.broadcast %cst_8 : f32 to vector<1x128xf32>
    %28 = arith.subf %27, %26 : vector<1x128xf32>
    %c128_i32 = arith.constant 128 : i32
    %29 = arith.muli %arg0, %c128_i32 : i32
    %30 = tpu.iota {dimensions = array<i32: 1>} : vector<1x128xi32>
    %31 = vector.broadcast %29 : i32 to vector<1x128xi32>
    %32 = arith.addi %31, %30 : vector<1x128xi32>
    %c16_i32_9 = arith.constant 16 : i32
    %33 = vector.broadcast %c16_i32_9 : i32 to vector<1x128xi32>
    %34 = arith.cmpi slt, %32, %33 : vector<1x128xi32>
    %cst_10 = arith.constant 0.000000e+00 : f32
    %35 = vector.broadcast %cst_10 : f32 to vector<1x128xf32>
    %36 = arith.select %34, %28, %35 : vector<1x128xi1>, vector<1x128xf32>
    %c0_11 = arith.constant 0 : index
    %c0_12 = arith.constant 0 : index
    %37 = vector.load %arg4[%c0_11, %c0_12] : memref<1x128xf32, #tpu.memory_space<vmem>>, vector<1x128xf32>
    tpu.vector_store %arg4[%c0_11, %c0_12], %36 {strides = array<i32>} : memref<1x128xf32, #tpu.memory_space<vmem>>, vector<1x128xf32>,
    return
  }
  func.func @transform_0(%arg0: i32) -> (i32, i32) {
    %c0_i32 = arith.constant 0 : i32
    %c0_i32_0 = arith.constant 0 : i32
    return %c0_i32, %arg0 : i32, i32
  }
  func.func @transform_1(%arg0: i32) -> (i32, i32) {
    %c0_i32 = arith.constant 0 : i32
    %c0_i32_0 = arith.constant 0 : i32
    return %c0_i32, %arg0 : i32, i32
  }
  func.func @transform_2(%arg0: i32) -> (i32, i32) {
    %c0_i32 = arith.constant 0 : i32
    %c0_i32_0 = arith.constant 0 : i32
    %c0_i32_1 = arith.constant 0 : i32
    return %c0_i32, %c0_i32_0 : i32, i32
  }
  func.func @transform_3(%arg0: i32) -> (i32, i32) {
    %c0_i32 = arith.constant 0 : i32
    %c0_i32_0 = arith.constant 0 : i32
    return %c0_i32, %arg0 : i32, i32
  }
}

</mosaic_0001>

<bundles_post_ra>
// kernel: tpu_custom_call.1
= control target key start
LH: loop header
LB: loop body
LE: loop exit
PB: predicated region body
PF: predicated region fallthrough
CT: control target
= control target key end

     0   :  { %9 = vsyncpa [#allocation4], 0  ;;  %s241_s0 = inlined_call_operand.hbm [shape: f32[16,128], index: 0, kind: input, shape index: {}]   ;;  %s242_s1 = inlined_call_operand.hbm [shape: f32[16,128], index: 1, kind: input, shape index: {}]   ;;  %s243_s2 = inlined_call_operand.<no memory space> [shape: f32[1,1], index: 2, kind: input, shape index: {}]   ;;  %s244_s3 = inlined_call_operand.hbm [shape: f32[1,128], index: 3, kind: output, shape index: {}]  }
   0x1   :  { %10 = vsyncpa [#allocation7], 0 }
   0x2   :  { %11 = vsyncpa [#allocation5], 0  ;;  %s204_s12 = smov [#allocation3]  }
   0x3   :  { %s17_s13 = sshll.u32 %s204_s12, 4  ;;  %s18_s13 = int_to_ptr.vmem [resolvable:$true] %s17_s13 }
   0x4   :  { %s146_s14 = scalar_lea.vmem %s18_s13, 256  ;;  %p151_p1 = scmp.lt.s32.totalorder %s18_s13, %s18_s13 }
   0x5   :  { %p147_p0 = scmp.ne.s32.totalorder %s18_s13, %s146_s14  ;;  %p152_p2 = scmp.lt.s32.totalorder %s146_s14, %s146_s14 }
   0x7   :  { %p153_p3 = por %p152_p2, %p151_p1 }
   0x9   :  { %p154_p4 = pnand %p153_p3, %p147_p0 }
   0xb   :  { %157 = shalt.err (!%p154_p4)
}
   0xc   :  { %s205_s15 = smov 128   ;;  %s206_s16 = smov 8  }
   0xd   :  { %23 = dma.hbm_to_vmem [thread:$0]  %s241_s0, 256, %s18_s13, [#allocation4], %s205_s15, %s205_s15, %s206_s16  }
   0xe   :  { %s207_s19 = smov [#allocation6]  }
   0xf   :  { %s29_s20 = sshll.u32 %s207_s19, 4  ;;  %s30_s20 = int_to_ptr.vmem [resolvable:$true] %s29_s20 }
  0x10   :  { %s166_s21 = scalar_lea.vmem %s30_s20, 256  ;;  %p171_p6 = scmp.lt.s32.totalorder %s30_s20, %s30_s20 }
  0x11   :  { %p167_p5 = scmp.ne.s32.totalorder %s30_s20, %s166_s21  ;;  %p172_p7 = scmp.lt.s32.totalorder %s166_s21, %s166_s21 }
  0x13   :  { %p173_p8 = por %p172_p7, %p171_p6 }
  0x15   :  { %p174_p9 = pnand %p173_p8, %p167_p5 }
  0x17   :  { %177 = shalt.err (!%p174_p9)
}
  0x18   :  { %35 = dma.hbm_to_vmem [thread:$0]  %s242_s1, 256, %s30_s20, [#allocation7], %s205_s15, %s205_s15, %s206_s16  }
  0x19   :  { %198 = dma.done.wait [#allocation4], 256  }
  0x1a   :  { %199 = vsyncadd [#allocation4], 4294967040 }
  0x1b   :  { %200 = dma.done.wait [#allocation7], 256  }
  0x1c   :  { %201 = vsyncadd [#allocation7], 4294967040  ;;  %v50_v0 = vld [vmem:[#allocation6] sm:$0xff]  ;;  %v51_v1 = vld [vmem:[#allocation6 + $0x8] sm:$0xff]  ;;  %v47_v5 = vstv %s243_s2  ;;  %v76_v25 = vlaneseq  ;;  %s208_s1 = smov [#allocation8]  }
  0x1d   :  { %v52_v2 = vmul.f32 15.0, %v50_v0  ;;  %v53_v3 = vmul.f32 15.0, %v51_v1  ;;  %v45_v4 = vld [vmem:[#allocation3] sm:$0xff]  ;;  %v46_v6 = vld [vmem:[#allocation3 + $0x8] sm:$0xff]  ;;  %s111_s2 = sshll.u32 %s208_s1, 4  ;;  %s112_s2 = int_to_ptr.vmem [resolvable:$true] %s111_s2 }
  0x1e   :  { %v48_v7 = vsub.f32 %v45_v4, %v47_v5  ;;  %v49_v9 = vsub.f32 %v46_v6, %v47_v5  ;;  %v77_v26 = vshrl.u32 %v76_v25, 7  ;;  %v99_v41 = vand.u32 127, %v76_v25  ;;  %s178_s25 = scalar_lea.vmem %s112_s2, 16  ;;  %s182_s26 = scalar_lea.vmem %s112_s2, 32 }
  0x1f   :  { %126 = vlog2.f32 %v52_v2  ;;  %p179_p10 = scmp.ne.s32.totalorder %s112_s2, %s178_s25  ;;  %p183_p11 = scmp.lt.s32.totalorder %s112_s2, %s112_s2 }
  0x20   :  { %128 = vlog2.f32 %v53_v3  ;;  %vm79_vm0 = vcmp.eq.s32.totalorder %v77_v26, 0  ;;  %vm102_vm1 = vcmp.lt.s32.totalorder %v99_v41, 16  ;;  %p184_p12 = scmp.lt.s32.totalorder %s182_s26, %s178_s25 }
  0x22   :  { %p185_p13 = por %p184_p12, %p183_p11 }
  0x24   :  { %p186_p0 = pnand %p185_p13, %p179_p10 }
  0x2c   :  { %v127_v8 = vpop.eup %126 }
  0x2d   :  { %v129_v10 = vpop.eup %128  ;;  %v55_v11 = vmul.f32 0.6931472, %v127_v8 }
  0x2e   :  { %v57_v12 = vmul.f32 0.6931472, %v129_v10 }
  0x2f   :  { %v58_v13 = vmax.f32 %v55_v11, %v48_v7  ;;  %v60_v14 = vmin.f32 %v55_v11, %v48_v7  ;;  %v81_v31 = vsel %vm79_vm0, %v48_v7, %v55_v11 }
  0x30   :  { %v59_v15 = vmax.f32 %v57_v12, %v49_v9  ;;  %v61_v16 = vmin.f32 %v57_v12, %v49_v9 }
  0x31   :  { %v62_v17 = vsub.f32 %v60_v14, %v58_v13 }
  0x32   :  { %v63_v18 = vsub.f32 %v61_v16, %v59_v15 }
  0x33   :  { %v64_v19 = vmul.f32 1.442695, %v62_v17 }
  0x34   :  { %v66_v20 = vmul.f32 1.442695, %v63_v18 }
  0x35   :  { %130 = vpow2.f32 %v64_v19 }
  0x36   :  { %132 = vpow2.f32 %v66_v20 }
  0x42   :  { %v131_v21 = vpop.eup %130 }
  0x43   :  { %v133_v22 = vpop.eup %132  ;;  %v68_v23 = vadd.f32 1.0, %v131_v21 }
  0x44   :  { %v69_v24 = vadd.f32 1.0, %v133_v22 }
  0x45   :  { %134 = vlog2.f32 %v68_v23 }
  0x46   :  { %136 = vlog2.f32 %v69_v24 }
  0x52   :  { %v135_v27 = vpop.eup %134 }
  0x53   :  { %v137_v28 = vpop.eup %136  ;;  %v71_v29 = vmul.f32 0.6931472, %v135_v27 }
  0x54   :  { %v73_v30 = vmul.f32 0.6931472, %v137_v28 }
  0x55   :  { %v74_v32 = vadd.f32 %v71_v29, %v58_v13 }
  0x56   :  { %v75_v33 = vadd.f32 %v73_v30, %v59_v15 }
  0x57   :  { %v85_v34 = vsub.f32 %v81_v31, %v74_v32 }
  0x58   :  { %v86_v35 = vsub.f32 %v57_v12, %v75_v33 }
  0x5a   :  { %v89_v36 = vadd.f32 %v86_v35, %v85_v34 }
  0x5c   :  { %v90_v37 = vrot.slane %v89_v36, 4 }
  0x5e   :  { %v91_v38 = vadd.f32 %v90_v37, %v89_v36 }
  0x60   :  { %v92_v39 = vrot.slane %v91_v38, 2 }
  0x62   :  { %v93_v40 = vadd.f32 %v92_v39, %v91_v38 }
  0x64   :  { %v94_v42 = vrot.slane %v93_v40, 1 }
  0x66   :  { %v95_v43 = vadd.f32 %v94_v42, %v93_v40 }
  0x68   :  { %v96_v44 = vsub.f32 0.0, %v95_v43 }
  0x6a   :  { %v103_v45 = vsel %vm102_vm1, %v96_v44, 0.0 }
  0x6b   :  { %104 = vst [vmem:[#allocation8] sm:$0x1] %v103_v45 }
  0x6c   :  { %189 = shalt.err (!%p186_p0)
}
  0x6d   :  { %114 = dma.vmem_to_hbm [thread:$0]  %s112_s2, 16, %s244_s3, [#allocation5]  }
  0x6e   :  { %202 = dma.done.wait [#allocation5], 16  }
  0x6f   :  { %203 = vsyncadd [#allocation5], 4294967280 }
  0x70   :  { %118 = vsyncpa [#allocation4], 1 }
  0x71   :  { %119 = vsyncpa [#allocation7], 1 }
  0x72   :  { %120 = vsyncpa [#allocation5], 1 }

</bundles_post_ra>
